<compile_context>
chip_gen: v7x
topology: tpu7x:2x2x1
jax: 0.10.0
libtpu: 0.0.40
codegen_flags: <defaults>
</compile_context>

<pallas_src>
import functools

import jax
import jax.numpy as jnp
from jax.experimental import pallas as pl
from jax.experimental.pallas import tpu as pltpu


def _round_up(x, m):
    return (x + m - 1) // m * m


# ----------------------------- kernels ------------------------------------ #
# Multi-K-step kernels: accumulate directly into the f32, K-resident output
# block.  Bias is folded into the k==0 initialization.

def _dl_kernel_acc_bias(x_ref, w_ref, b_ref, o_ref):
    @pl.when(pl.program_id(2) == 0)
    def _():
        o_ref[...] = jnp.broadcast_to(b_ref[...].astype(jnp.float32),
                                      o_ref.shape)
    o_ref[...] += jnp.dot(x_ref[...], w_ref[...],
                          preferred_element_type=jnp.float32)


def _dl_kernel_acc_nobias(x_ref, w_ref, o_ref):
    @pl.when(pl.program_id(2) == 0)
    def _():
        o_ref[...] = jnp.zeros_like(o_ref)
    o_ref[...] += jnp.dot(x_ref[...], w_ref[...],
                          preferred_element_type=jnp.float32)


# Single-K-step kernels (K grid == 1): no accumulator plumbing at all.

def _dl_kernel_single_bias(x_ref, w_ref, b_ref, o_ref):
    o_ref[...] = (jnp.dot(x_ref[...], w_ref[...],
                          preferred_element_type=jnp.float32)
                  + b_ref[...].astype(jnp.float32)).astype(o_ref.dtype)


def _dl_kernel_single_nobias(x_ref, w_ref, o_ref):
    o_ref[...] = jnp.dot(x_ref[...], w_ref[...],
                         preferred_element_type=jnp.float32).astype(o_ref.dtype)


# ----------------------------- wrapper ------------------------------------ #

def _forward_impl(x, w_t, b2d, *, n_active):
    """x: (B, K_active).  w_t: (K_maxp, N_maxp) pre-transposed, zero-padded,
    in the compute dtype (bf16 by default).  b2d: (1, N_maxp) f32 or None.
    Returns (B, n_active) float32."""
    batch, k_active = x.shape

    # Compute dtype follows the prepared weight (bf16 default / f32 strict).
    op_dtype = w_t.dtype
    x = x.astype(op_dtype)
    op_bytes = jnp.dtype(op_dtype).itemsize
    sublane = 8 * (4 // op_bytes)          # 8 for f32, 16 for bf16

    # Padded active extents (lane-dense: multiples of 128 on K and N).
    k_pad = _round_up(k_active, 128)
    n_pad = _round_up(n_active, 128)

    # ---- tile selection ----------------------------------------------------
    # tm: minimize M padding (no round-up of batch to the full tile cap).
    tm_cap = 512 if batch >= 512 else 256
    tm = _round_up(pl.cdiv(batch, pl.cdiv(batch, tm_cap)), sublane)
    m_pad = _round_up(batch, tm)

    # tn / tk: biggest aligned tiles; budgeted against v7x's 64 MiB VMEM.
    tn = 512 if n_pad % 512 == 0 else (256 if n_pad % 256 == 0 else 128)
    tk = (1024 if k_pad % 1024 == 0 else
          (512 if k_pad % 512 == 0 else (256 if k_pad % 256 == 0 else 128)))

    # v7x megacore: guarantee >= 2 blocks on the ("parallel","parallel") axes
    # when possible (harmless on single-TC v5e/v6e).
    if (m_pad // tm == 1) and (n_pad // tn == 1):
        if tn % 256 == 0:
            tn //= 2
        elif tm % (2 * sublane) == 0:
            tm //= 2

    # Zero-pad x: padded K columns multiply real (but irrelevant) weight rows
    # by zero; padded M rows / output columns are sliced away below.
    if (m_pad, k_pad) != (batch, k_active):
        x = jnp.pad(x, ((0, m_pad - batch), (0, k_pad - k_active)))

    grid_m, grid_n, grid_k = m_pad // tm, n_pad // tn, k_pad // tk
    has_bias = b2d is not None

    # Advisory cost estimate: count re-streaming (x read grid_n times, weight
    # read grid_m times) plus the output write.
    cost = pl.CostEstimate(
        flops=2 * m_pad * k_pad * n_pad,
        transcendentals=0,
        bytes_accessed=(m_pad * k_pad * op_bytes * grid_n
                        + k_pad * n_pad * op_bytes * grid_m
                        + m_pad * n_pad * 4),
    )

    # VMEM working set (double-buffered inputs + resident/double output) and a
    # generous headroom; well under v7x's 64 MiB physical.
    working = (2 * (tm * tk * op_bytes + tk * tn * op_bytes
                    + (tn * 4 if has_bias else 0))
               + 2 * tm * tn * 4)
    vmem_limit = int(working + (8 << 20))

    if grid_k == 1:
        grid = (grid_m, grid_n)
        dims = ("parallel", "parallel")
        in_specs = [pl.BlockSpec((tm, tk), lambda i, j: (i, 0)),
                    pl.BlockSpec((tk, tn), lambda i, j: (0, j))]
        out_spec = pl.BlockSpec((tm, tn), lambda i, j: (i, j))
        bias_spec = pl.BlockSpec((1, tn), lambda i, j: (0, j))
        kernel = _dl_kernel_single_bias if has_bias else _dl_kernel_single_nobias
    else:
        grid = (grid_m, grid_n, grid_k)
        dims = ("parallel", "parallel", "arbitrary")
        in_specs = [pl.BlockSpec((tm, tk), lambda i, j, k: (i, k)),
                    pl.BlockSpec((tk, tn), lambda i, j, k: (k, j))]
        out_spec = pl.BlockSpec((tm, tn), lambda i, j, k: (i, j))
        bias_spec = pl.BlockSpec((1, tn), lambda i, j, k: (0, j))
        kernel = _dl_kernel_acc_bias if has_bias else _dl_kernel_acc_nobias

    operands = [x, w_t]
    if has_bias:
        in_specs.append(bias_spec)
        operands.append(b2d)

    out = pl.pallas_call(
        kernel,
        out_shape=jax.ShapeDtypeStruct((m_pad, n_pad), jnp.float32),
        grid_spec=pltpu.PrefetchScalarGridSpec(
            num_scalar_prefetch=0,
            grid=grid,
            in_specs=in_specs,
            out_specs=out_spec,
        ),
        compiler_params=pltpu.CompilerParams(
            dimension_semantics=dims,
            vmem_limit_bytes=vmem_limit),
        cost_estimate=cost,
    )(*operands)

    return out[:batch, :n_active]


@functools.partial(jax.jit, static_argnames=("n_active",))
def _dynamic_linear_forward_bias(x, w_t, b2d, *, n_active):
    return _forward_impl(x, w_t, b2d, n_active=n_active)


@functools.partial(jax.jit, static_argnames=("n_active",))
def _dynamic_linear_forward_nobias(x, w_t, *, n_active):
    return _forward_impl(x, w_t, None, n_active=n_active)


# ----------------------------- module ------------------------------------- #

class DynamicLinear:
    """JAX/Pallas equivalent of the PyTorch DynamicLinear module.

    precision="bf16" (default): bf16 operands, f32 accumulation (fast path).
    precision="float32": strict f32 operands (matches F.linear numerics).
    """

    def __init__(self, max_in_features, max_out_features, bias=True, *,
                 key=None, precision="bf16"):
        self.max_in_features = max_in_features
        self.max_out_features = max_out_features
        self.bias = bias
        self.active_out_features = max_out_features
        self.precision = precision
        op_dtype = jnp.float32 if precision == "float32" else jnp.bfloat16

        if key is None:
            key = jax.random.PRNGKey(0)
        k_w, k_b = jax.random.split(key)
        bound = 1.0 / (max_in_features ** 0.5)
        # PyTorch-layout weight (out, in) kept in f32 for reference/inspection.
        self.weight = jax.random.uniform(
            k_w, (max_out_features, max_in_features),
            dtype=jnp.float32, minval=-bound, maxval=bound)
        if bias:
            self.bias_param = jax.random.uniform(
                k_b, (max_out_features,), dtype=jnp.float32,
                minval=-bound, maxval=bound)
        else:
            self.bias_param = None

        # Kernel-layout parameters built ONCE: transposed to (K, N),
        # zero-padded to 128-multiples, and cast to the compute dtype so the
        # per-call active window is a lane/sublane-aligned prefix of this
        # array.  No per-call weight slice/copy is ever made — the grid simply
        # never touches inactive blocks.
        k_maxp = _round_up(max_in_features, 128)
        n_maxp = _round_up(max_out_features, 128)
        self._weight_t = jnp.zeros((k_maxp, n_maxp), op_dtype).at[
            :max_in_features, :max_out_features].set(
                self.weight.T.astype(op_dtype))
        if bias:
            # Bias stays f32 (added into the f32 accumulator; bytes negligible).
            self._bias2d = jnp.zeros((1, n_maxp), jnp.float32).at[
                0, :max_out_features].set(self.bias_param)
        else:
            self._bias2d = None

    def __call__(self, x, out_features=None):
        if out_features is None:
            out_features = self.active_out_features
        if self.bias:
            return _dynamic_linear_forward_bias(
                x, self._weight_t, self._bias2d, n_active=out_features)
        return _dynamic_linear_forward_nobias(
            x, self._weight_t, n_active=out_features)


# ------------------------------ test --------------------------------------- #

if __name__ == "__main__":
    key = jax.random.PRNGKey(0)
    k_x, k_mod = jax.random.split(key)

    max_in_features = 32
    max_out_features = 32
    batch = 8
    in_features = 16      # x uses only a slice of the input dim
    out_features = 24     # active slice of the output dim

    x = jax.random.normal(k_x, (batch, in_features), dtype=jnp.float32)

    # Default fast path: bf16 operands, f32 accumulation.
    module = DynamicLinear(max_in_features, max_out_features, bias=True, key=k_mod)
    y = jax.block_until_ready(module(x, out_features=out_features))

    w_ref = module.weight[:out_features, :in_features]
    b_ref = module.bias_param[:out_features]
    y_ref = x @ w_ref.T + b_ref
    assert y.shape == (batch, out_features)
    assert jnp.allclose(y, y_ref, atol=2e-2, rtol=2e-2)

    # Default (full) out_features path.
    y_full = jax.block_until_ready(module(x))
    y_full_ref = x @ module.weight[:, :in_features].T + module.bias_param
    assert y_full.shape == (batch, max_out_features)
    assert jnp.allclose(y_full, y_full_ref, atol=2e-2, rtol=2e-2)

    # Strict float32 path (tight match with F.linear numerics).
    module_f32 = DynamicLinear(max_in_features, max_out_features, bias=True,
                               key=k_mod, precision="float32")
    y32 = jax.block_until_ready(module_f32(x, out_features=out_features))
    assert jnp.allclose(y32, y_ref, atol=1e-5, rtol=1e-5)

    # bias=False path (no bias operand, separate kernel variant).
    module_nb = DynamicLinear(max_in_features, max_out_features, bias=False, key=k_mod)
    y_nb = jax.block_until_ready(module_nb(x, out_features=out_features))
    y_nb_ref = x @ module_nb.weight[:out_features, :in_features].T
    assert jnp.allclose(y_nb, y_nb_ref, atol=2e-2, rtol=2e-2)

    print("KERNEL_OK")
</pallas_src>

<mosaic_0001>
module attributes {stable_mosaic.version = 11 : i64} {
  func.func @_dl_kernel_single_bias(%arg0: i32, %arg1: i32, %arg2: memref<16x128xbf16, #tpu.memory_space<vmem>>, %arg3: memref<128x128xbf16, #tpu.memory_space<vmem>>, %arg4: memref<1x128xf32, #tpu.memory_space<vmem>>, %arg5: memref<16x128xf32, #tpu.memory_space<vmem>>) attributes {dimension_semantics = [#tpu.dimension_semantics<parallel>, #tpu.dimension_semantics<parallel>], iteration_bounds = array<i64: 1, 1>, scalar_prefetch = 0 : i64, scratch_operands = 0 : i64, tpu.core_type = #tpu.core_type<tc>, window_params = [{transform_indices = @transform_0, window_bounds = array<i64: 16, 128>}, {transform_indices = @transform_1, window_bounds = array<i64: 128, 128>}, {transform_indices = @transform_2, window_bounds = array<i64: 1, 128>}, {transform_indices = @transform_3, window_bounds = array<i64: 16, 128>}]} {
    %c0 = arith.constant 0 : index
    %c0_0 = arith.constant 0 : index
    %0 = vector.load %arg2[%c0, %c0_0] : memref<16x128xbf16, #tpu.memory_space<vmem>>, vector<16x128xbf16>
    %c0_1 = arith.constant 0 : index
    %c0_2 = arith.constant 0 : index
    %1 = vector.load %arg3[%c0_1, %c0_2] : memref<128x128xbf16, #tpu.memory_space<vmem>>, vector<128x128xbf16>
    %cst = arith.constant dense<0.000000e+00> : vector<16x128xf32>
    %2 = tpu.matmul %0, %1, %cst {dimension_numbers = #tpu.dot_dimension_numbers<[1], [0], [0], [1], [0, 0, 1, 1], [], []>} : vector<16x128xbf16>, vector<128x128xbf16>, vector<16x128xf32> -> vector<16x128xf32>
    %c0_3 = arith.constant 0 : index
    %c0_4 = arith.constant 0 : index
    %3 = vector.load %arg4[%c0_3, %c0_4] : memref<1x128xf32, #tpu.memory_space<vmem>>, vector<1x128xf32>
    %4 = vector.broadcast %3 : vector<1x128xf32> to vector<16x128xf32>
    %5 = arith.addf %2, %4 : vector<16x128xf32>
    %c0_5 = arith.constant 0 : index
    %c0_6 = arith.constant 0 : index
    %6 = vector.load %arg5[%c0_5, %c0_6] : memref<16x128xf32, #tpu.memory_space<vmem>>, vector<16x128xf32>
    tpu.vector_store %arg5[%c0_5, %c0_6], %5 {strides = array<i32>} : memref<16x128xf32, #tpu.memory_space<vmem>>, vector<16x128xf32>,
    return
  }
  func.func @transform_0(%arg0: i32, %arg1: i32) -> (i32, i32) {
    %c0_i32 = arith.constant 0 : i32
    %c0_i32_0 = arith.constant 0 : i32
    return %arg0, %c0_i32 : i32, i32
  }
  func.func @transform_1(%arg0: i32, %arg1: i32) -> (i32, i32) {
    %c0_i32 = arith.constant 0 : i32
    %c0_i32_0 = arith.constant 0 : i32
    return %c0_i32, %arg1 : i32, i32
  }
  func.func @transform_2(%arg0: i32, %arg1: i32) -> (i32, i32) {
    %c0_i32 = arith.constant 0 : i32
    %c0_i32_0 = arith.constant 0 : i32
    return %c0_i32, %arg1 : i32, i32
  }
  func.func @transform_3(%arg0: i32, %arg1: i32) -> (i32, i32) {
    %c0_i32 = arith.constant 0 : i32
    return %arg0, %arg1 : i32, i32
  }
}

</mosaic_0001>

<bundles_post_ra>
// kernel: _dynamic_linear_forward_bias.1
= control target key start
LH: loop header
LB: loop body
LE: loop exit
PB: predicated region body
PF: predicated region fallthrough
CT: control target
= control target key end

     0   :  { %8 = vsyncpa [#allocation3], 0  ;;  %s233_s12 = smov [#allocation2]   ;;  %s282_s0 = inlined_call_operand.vmem [shape: bf16[16,128], index: 0, kind: input, shape index: {}]   ;;  %s283_s1 = inlined_call_operand.hbm [shape: bf16[128,128], index: 1, kind: input, shape index: {}]   ;;  %s284_s2 = inlined_call_operand.vmem [shape: f32[1,128], index: 2, kind: input, shape index: {}]   ;;  %s285_s3 = inlined_call_operand.vmem [shape: f32[16,128], index: 3, kind: output, shape index: {}]  }
   0x1   :  { %s16_s13 = sshll.u32 %s233_s12, 4  ;;  %s209_s16 = scalar_lea.hbm %s283_s1, 1024  ;;  %s17_s13 = int_to_ptr.vmem [resolvable:$true] %s16_s13 }
   0x2   :  { %p210_p0 = scmp.ne.s32.totalorder %s283_s1, %s209_s16  ;;  %p213_p1 = scmp.lt.u32.totalorder %s209_s16, %s283_s1 }
   0x4   :  { %p215_p2 = pnand %p213_p1, %p210_p0 }
   0x6   :  { %218 = shalt.err (!%p215_p2)
}
   0x7   :  { %s219_s21 = scalar_lea.vmem %s17_s13, 1024  ;;  %p224_p4 = scmp.lt.s32.totalorder %s17_s13, %s17_s13 }
   0x8   :  { %p220_p3 = scmp.ne.s32.totalorder %s17_s13, %s219_s21  ;;  %p225_p5 = scmp.lt.s32.totalorder %s219_s21, %s219_s21 }
   0xa   :  { %p226_p6 = por %p225_p5, %p224_p4 }
   0xc   :  { %p227_p7 = pnand %p226_p6, %p220_p3 }
   0xe   :  { %230 = shalt.err (!%p227_p7)
}
   0xf   :  { %s234_s22 = smov 64   ;;  %s235_s23 = smov 4  }
  0x10   :  { %22 = dma.hbm_to_vmem [thread:$0]  %s283_s1, 1024, %s17_s13, [#allocation3], %s234_s22, %s234_s22, %s235_s23  }
  0x11   :  { %231 = dma.done.wait [#allocation3], 1024  }
  0x12   :  { %232 = vsyncadd [#allocation3], 4294966272  ;;  %v236_v0 = vmov 0.0   ;;  %vm237_vm0 = vmmov 0   ;;  %v200_v1 = vld [vmem:[#allocation2] sm:$0xff]   ;;  %v201_v2 = vld [vmem:[#allocation2 + $0x8] sm:$0xff]  }
  0x13   :  { %175 = vmatprep.subr.bf16.mxu0 %v236_v0  ;;  %191 = vmatprep.mubr.msk.bf16.mxu0 %vm237_vm0, %v236_v0  ;;  %v202_v3 = vld [vmem:[#allocation2 + $0x10] sm:$0xff]   ;;  %v203_v4 = vld [vmem:[#allocation2 + $0x18] sm:$0xff]   ;;  %v204_v5 = vld [vmem:[#allocation2 + $0x20] sm:$0xff]  }
  0x14   :  { %176 = vmatpush3.bf16.msra.mxu0 %v200_v1  ;;  %v205_v6 = vld [vmem:[#allocation2 + $0x28] sm:$0xff]   ;;  %v206_v7 = vld [vmem:[#allocation2 + $0x30] sm:$0xff]   ;;  %v207_v8 = vld [vmem:[#allocation2 + $0x38] sm:$0xff]  }
  0x15   :  { %177 = vmatprep.subr.bf16.mxu0 %v236_v0  ;;  %v208_v9 = vld [vmem:[%s282_s0] sm:$0xff]  }
  0x16   :  { %v156_v10 = vld [vmem:[%s284_s2] ss:$0 sm:$0xff] }
  0x18   :  { %178 = vmatpush3.bf16.msra.mxu0 %v201_v2 }
  0x19   :  { %179 = vmatprep.subr.bf16.mxu0 %v236_v0 }
  0x1c   :  { %180 = vmatpush3.bf16.msra.mxu0 %v202_v3 }
  0x1d   :  { %181 = vmatprep.subr.bf16.mxu0 %v236_v0 }
  0x20   :  { %182 = vmatpush3.bf16.msra.mxu0 %v203_v4 }
  0x21   :  { %183 = vmatprep.subr.bf16.mxu0 %v236_v0 }
  0x24   :  { %184 = vmatpush3.bf16.msra.mxu0 %v204_v5 }
  0x25   :  { %185 = vmatprep.subr.bf16.mxu0 %v236_v0 }
  0x28   :  { %186 = vmatpush3.bf16.msra.mxu0 %v205_v6 }
  0x29   :  { %187 = vmatprep.subr.bf16.mxu0 %v236_v0 }
  0x2c   :  { %188 = vmatpush3.bf16.msra.mxu0 %v206_v7 }
  0x2d   :  { %189 = vmatprep.subr.bf16.mxu0 %v236_v0 }
  0x30   :  { %190 = vmatpush3.bf16.msra.mxu0 %v207_v8 }
  0x33   :  { %192 = vmatmul.mubr.bf16.vlgmr.msra.gmra.mrb[0].mxu0 %v208_v9 }
 0x106   :  { %v142_v11 = vpop.f32.mrb[0].mxu0 }
 0x107   :  { %v143_v12 = vadd.f32 %v156_v10, %v142_v11  ;;  %v193_v13 = vpop.f32.mrb[1].mxu0 }
 0x108   :  { %v145_v14 = vpop.f32.mrb[2].mxu0 }
 0x109   :  { %149 = vst [vmem:[%s285_s3] sm:$0xff] %v143_v12  ;;  %v146_v15 = vadd.f32 %v156_v10, %v145_v14  ;;  %v194_v16 = vpop.f32.mrb[3].mxu0 }
 0x10b   :  { %150 = vst [vmem:[%s285_s3 + $0x8] sm:$0xff] %v146_v15 }
 0x10c   :  { %155 = vsyncpa [#allocation3], 1 }

</bundles_post_ra>
